<compile_context>
chip_gen: v5e
topology: v5e:2x2
jax: 0.10.0
libtpu: 0.0.40
codegen_flags: <defaults>
</compile_context>

<pallas_src>
import functools

import numpy as np
import jax
import jax.numpy as jnp
from jax.experimental import pallas as pl
from jax.experimental.pallas import tpu as pltpu


def _fishvect_kernel(x_ref, v_ref, vn_ref, vc_ref, vtc_s_ref, vnc_ref,
                     soft_ref, enc_ref, *,
                     num_centers, centers_per_step, num_chunks,
                     inv_sigma, inv_sig2, inv_2sig2, mu_scale, sg_scale,
                     precision):
    # x_ref:     (C, TP)        one batch element, one lane tile (f32)
    # v_ref:     (K_pad, C)     all centers (rows >= K are zero padding)
    # vn_ref:    (K_pad, 1)     ||v_k||^2/(2 sigma^2); +1e30 on padded rows
    # vc_ref:    (kpc, C)       this chunk's centers (for the chunk soft rows)
    # vtc_s_ref: (C, kpc)       this chunk's centers, transposed & pre-scaled by 1/sigma
    # vnc_ref:   (kpc, 1)       this chunk's ||v||^2/(2 sigma^2)
    # soft_ref:  (K, TP)        soft assignment output (written on last chunk)
    # enc_ref:   (2, kpc*C, TP) [FV_mu_part ; FV_sigma_part] rows for this chunk
    chunk = pl.program_id(2)
    x = x_ref[...]                                                  # (C, TP)

    # ---- soft assignment over ALL centers (needed for the normalizer) ------
    vx = jnp.dot(v_ref[...], x, preferred_element_type=jnp.float32,
                 precision=precision)                               # (K_pad, TP)
    xnorm = jnp.sum(x * x, axis=0, keepdims=True)                   # (1, TP)
    tao = vx * inv_sig2 - xnorm * inv_2sig2 - vn_ref[...]           # (K_pad, TP)
    m = jnp.max(tao, axis=0, keepdims=True)
    e = jnp.exp(tao - m)
    inv_denom = 1.0 / jnp.sum(e, axis=0, keepdims=True)             # one rcp / column

    @pl.when(chunk == num_chunks - 1)
    def _():
        soft_ref[...] = (e[:num_centers] * inv_denom).astype(soft_ref.dtype)

    # ---- soft rows for this chunk of centers --------------------------------
    if num_chunks == 1:
        soft_c = e[:centers_per_step] * inv_denom                   # (kpc, TP)
    else:
        # Cheap recompute of just this chunk's rows (same contraction order as
        # the full matmul -> identical values); avoids dynamic sublane slicing.
        vxc = jnp.dot(vc_ref[...], x, preferred_element_type=jnp.float32,
                      precision=precision)                          # (kpc, TP)
        taoc = vxc * inv_sig2 - xnorm * inv_2sig2 - vnc_ref[...]
        soft_c = jnp.exp(taoc - m) * inv_denom

    # Fold the scalar FV normalisation factors into soft once.
    soft_mu = soft_c * mu_scale
    soft_sg = soft_c * sg_scale

    # ---- stream per-center (C, TP) slabs straight into the output block ----
    x_s = x * inv_sigma                                             # hoisted 1/sigma
    vt_s = vtc_s_ref[...]                                           # (C, kpc), pre-scaled
    C = x.shape[0]
    for j in range(centers_per_step):                               # bounded unroll
        xs = x_s - vt_s[:, j:j + 1]                                 # (C, TP)
        enc_ref[0, j * C:(j + 1) * C, :] = (xs * soft_mu[j:j + 1, :]).astype(enc_ref.dtype)
        enc_ref[1, j * C:(j + 1) * C, :] = ((xs * xs - 1.0) * soft_sg[j:j + 1, :]).astype(enc_ref.dtype)


def _vmem_budgets():
    """Generation-aware VMEM limit and per-block budget (v5e/v6e: 128 MiB,
    v7x: 64 MiB per TensorCore)."""
    cap = 64 << 20  # conservative fallback (v7x-sized)
    try:
        cap = int(pltpu.get_tpu_info().vmem_capacity_bytes)
    except Exception:
        pass
    vmem_limit = max(min(cap - (24 << 20), (3 * cap) // 4), 32 << 20)
    block_budget = max(8 << 20, vmem_limit // 3)
    return vmem_limit, block_budget


def _choose_tiling(N, P, C, K, K_pad, out_bytes, block_budget):
    """Pick (lane_tile, centers_per_step).

    Prefers the largest lane tile that (a) fits the double-buffered blocks in
    the budget and (b) leaves >= ~8 parallel grid steps (megacore + pipeline);
    prefers no center chunking, but chunks (kpc | K, kpc*C % 8 == 0) when the
    enc block would otherwise force the lane tile down, or to bound the static
    per-step unroll when K is large."""
    if P % 128 == 0:
        tps = [t for t in range(min(P, 2048), 0, -128) if P % t == 0]
    else:
        tps = [P]    # block must equal the full dim in that case

    divs = [d for d in range(1, K) if K % d == 0 and (d * C) % 8 == 0]
    if K <= 32:
        kpcs = [K] + sorted(divs, reverse=True)
    else:
        mid = sorted([d for d in divs if d <= 32], reverse=True)
        rest = sorted([d for d in divs if d > 32], reverse=True)
        kpcs = mid + [K] + rest

    def fits(tp, kpc):
        per_lane = (2 * C * 4                          # x (f32, double buffered)
                    + 2 * 2 * kpc * C * out_bytes      # enc block (double buffered)
                    + 2 * K * out_bytes                # soft block
                    + 4 * (3 * K_pad + 4 * C))         # live f32 intermediates
        const = 8 * K_pad * C * 4                      # small parameter blocks
        return per_lane * tp + const <= block_budget

    def pick_tp(feas):
        for min_steps in (8, 4, 1):
            for tp in feas:                            # descending
                if N * (P // tp) >= min_steps:
                    return tp
        return feas[-1]

    best = None
    for kpc in kpcs:
        feas = [tp for tp in tps if fits(tp, kpc)]
        if not feas:
            continue
        tp = pick_tp(feas)
        if best is None:
            best = (tp, kpc)
        if tp >= min(512, tps[0]):
            return tp, kpc
    if best is not None:
        return best
    return tps[-1], kpcs[-1]


def fishvect_encode(x_nchw, V, pi, sigma, *, out_dtype=jnp.float32,
                    lane_tile=None, centers_per_step=None, precision=None):
    """Pallas implementation of FishVectEncoder.forward.

    Returns (soft_assignment [N,K,H,W], encoded_descriptors [N,2*K*C,H,W]),
    both in `out_dtype` (float32 = module semantics; bfloat16 halves the
    dominant HBM store traffic of this write-bound kernel)."""
    N, C, H, W = x_nchw.shape
    K = V.shape[0]
    P = H * W
    K_pad = -(-K // 8) * 8                      # pad centers to a sublane multiple

    sigma = float(sigma)
    pi = float(pi)
    inv_2sig2 = 1.0 / (2.0 * sigma * sigma)

    out_dtype = jnp.dtype(out_dtype)
    out_bytes = out_dtype.itemsize

    vmem_limit, block_budget = _vmem_budgets()
    tp_auto, kpc_auto = _choose_tiling(N, P, C, K, K_pad, out_bytes, block_budget)
    TP = int(lane_tile) if lane_tile is not None else tp_auto
    kpc = int(centers_per_step) if centers_per_step is not None else kpc_auto
    assert P % TP == 0, (P, TP)
    assert K % kpc == 0, (K, kpc)
    num_chunks = K // kpc
    assert num_chunks == 1 or (kpc * C) % 8 == 0, \
        "center chunking needs centers_per_step * C to be a multiple of 8"

    if precision is None:
        # At tiny C the MXU is nearly idle, so the 6-pass f32 path is free and
        # keeps <=5e-5 agreement; for larger C drop to the 3-pass path.
        precision = (jax.lax.Precision.HIGHEST if C <= 16 else jax.lax.Precision.HIGH)

    x = x_nchw.reshape(N, C, P).astype(jnp.float32)
    Vf = V.astype(jnp.float32)
    V_pad = jnp.zeros((K_pad, C), jnp.float32).at[:K].set(Vf)
    # ||v_k||^2 / (2 sigma^2); padded rows get +1e30 so they vanish in softmax.
    vn = jnp.full((K_pad, 1), 1e30, jnp.float32).at[:K, 0].set(
        jnp.sum(Vf * Vf, axis=1) * inv_2sig2)

    # Per-chunk center parameters (tiny), indexed by the 3rd grid axis.
    Vc = Vf.reshape(num_chunks, kpc, C)                         # (nc, kpc, C)
    Vtc_s = jnp.transpose(Vc, (0, 2, 1)) * (1.0 / sigma)        # (nc, C, kpc), pre-scaled
    vnc = (jnp.sum(Vc * Vc, axis=2) * inv_2sig2)[..., None]     # (nc, kpc, 1)

    kernel = functools.partial(
        _fishvect_kernel,
        num_centers=K,
        centers_per_step=kpc,
        num_chunks=num_chunks,
        inv_sigma=1.0 / sigma,
        inv_sig2=1.0 / (sigma * sigma),
        inv_2sig2=inv_2sig2,
        mu_scale=float(1.0 / np.sqrt(pi)),
        sg_scale=float(1.0 / np.sqrt(2.0 * pi)),
        precision=precision,
    )

    cost = pl.CostEstimate(
        flops=int(N * P * (2 * K_pad * C + 2 * kpc * C * num_chunks + 8 * K * C)),
        transcendentals=int(N * P * (K_pad + kpc) * num_chunks),
        bytes_accessed=int(N * P * (4 * C + out_bytes * (K + 2 * K * C))),
    )

    soft, enc = pl.pallas_call(
        kernel,
        out_shape=(
            jax.ShapeDtypeStruct((N, K, P), out_dtype),
            jax.ShapeDtypeStruct((N, 2, K * C, P), out_dtype),
        ),
        grid=(N, P // TP, num_chunks),
        in_specs=[
            pl.BlockSpec((None, C, TP), lambda n, p, c: (n, 0, p)),    # x tile
            pl.BlockSpec((K_pad, C), lambda n, p, c: (0, 0)),          # all centers
            pl.BlockSpec((K_pad, 1), lambda n, p, c: (0, 0)),          # ||v||^2/(2s^2)
            pl.BlockSpec((None, kpc, C), lambda n, p, c: (c, 0, 0)),   # chunk centers
            pl.BlockSpec((None, C, kpc), lambda n, p, c: (c, 0, 0)),   # chunk V^T / sigma
            pl.BlockSpec((None, kpc, 1), lambda n, p, c: (c, 0, 0)),   # chunk ||v||^2
        ],
        out_specs=(
            pl.BlockSpec((None, K, TP), lambda n, p, c: (n, 0, p)),
            pl.BlockSpec((None, 2, kpc * C, TP), lambda n, p, c: (n, 0, c, p)),
        ),
        compiler_params=pltpu.CompilerParams(
            dimension_semantics=("parallel", "parallel", "arbitrary"),
            vmem_limit_bytes=int(vmem_limit),
        ),
        cost_estimate=cost,
    )(x, V_pad, vn, Vc, Vtc_s, vnc)

    # (N,2,K*C,P)->(N,2*K*C,H,W) and (N,K,P)->(N,K,H,W) are free (metadata) reshapes.
    return soft.reshape(N, K, H, W), enc.reshape(N, 2 * K * C, H, W)


def fishvect_ref(x, V, pi, sigma):
    """Pure-JAX reference mirroring the PyTorch forward exactly."""
    xr = x[:, None]                                  # (N,1,C,H,W)
    Vb = V[None, :, :, None, None]                   # (1,K,C,1,1)
    xmv = xr - Vb                                    # (N,K,C,H,W)
    tao = jnp.sum(-(xmv * xmv) / (2.0 * sigma * sigma), axis=2)
    soft = jax.nn.softmax(tao, axis=1)               # (N,K,H,W)
    N, K, C, H, W = xmv.shape
    mu = (xmv / sigma) * soft[:, :, None] * (1.0 / np.sqrt(pi))
    sg = ((xmv / sigma) * (xmv / sigma) - 1.0) * soft[:, :, None] * (1.0 / np.sqrt(2.0 * pi))
    enc = jnp.concatenate(
        [mu.reshape(N, K * C, H, W), sg.reshape(N, K * C, H, W)], axis=1)
    return soft, enc


if __name__ == "__main__":
    key = jax.random.PRNGKey(0)
    kx, kv, kx2, kv2 = jax.random.split(key, 4)

    # Config 1: small shapes consistent with the module (NCHW input, K words);
    # H=W=32 gives P=1024 so the spatial grid axis is actually exercised.
    N, C, H, W = 2, 8, 32, 32
    K = 5
    pi_fv, sigma_fv = 0.5, 1.3
    x = jax.random.normal(kx, (N, C, H, W), dtype=jnp.float32)
    # Deterministic stand-in for nn.Parameter(torch.randn(K, C)[None,...,None,None]).
    V = jax.random.normal(kv, (K, C), dtype=jnp.float32)

    soft_ref_v, enc_ref_v = fishvect_ref(x, V, pi_fv, sigma_fv)

    # --- float32 outputs (exact module semantics) ---------------------------
    soft, enc = fishvect_encode(x, V, pi_fv, sigma_fv)
    jax.block_until_ready((soft, enc))
    assert soft.shape == (N, K, H, W)
    assert enc.shape == (N, 2 * K * C, H, W)
    np.testing.assert_allclose(np.asarray(soft), np.asarray(soft_ref_v),
                               atol=5e-5, rtol=5e-5)
    np.testing.assert_allclose(np.asarray(enc), np.asarray(enc_ref_v),
                               atol=5e-5, rtol=5e-5)

    # --- bfloat16 outputs: the main HBM-store-bandwidth lever ---------------
    soft_b, enc_b = fishvect_encode(x, V, pi_fv, sigma_fv, out_dtype=jnp.bfloat16)
    jax.block_until_ready((soft_b, enc_b))
    np.testing.assert_allclose(np.asarray(soft_b, dtype=np.float32),
                               np.asarray(soft_ref_v), atol=1e-2, rtol=1e-2)
    np.testing.assert_allclose(np.asarray(enc_b, dtype=np.float32),
                               np.asarray(enc_ref_v), atol=2e-2, rtol=2e-2)

    # --- Config 2: exercise the center-chunked grid path (large-K*C regime) -
    N2, C2, H2, W2, K2 = 2, 16, 16, 16, 8
    x2 = jax.random.normal(kx2, (N2, C2, H2, W2), dtype=jnp.float32)
    V2 = jax.random.normal(kv2, (K2, C2), dtype=jnp.float32)
    soft2, enc2 = fishvect_encode(x2, V2, pi_fv, sigma_fv,
                                  lane_tile=128, centers_per_step=4)
    jax.block_until_ready((soft2, enc2))
    soft2_r, enc2_r = fishvect_ref(x2, V2, pi_fv, sigma_fv)
    np.testing.assert_allclose(np.asarray(soft2), np.asarray(soft2_r),
                               atol=5e-5, rtol=5e-5)
    np.testing.assert_allclose(np.asarray(enc2), np.asarray(enc2_r),
                               atol=5e-5, rtol=5e-5)

    print("KERNEL_OK")
</pallas_src>

<mosaic_0001>
module attributes {stable_mosaic.version = 11 : i64} {
  func.func @_fishvect_kernel(%arg0: i32, %arg1: i32, %arg2: i32, %arg3: memref<1x8x256xf32, #tpu.memory_space<vmem>>, %arg4: memref<8x8xf32, #tpu.memory_space<vmem>>, %arg5: memref<8x1xf32, #tpu.memory_space<vmem>>, %arg6: memref<1x5x8xf32, #tpu.memory_space<vmem>>, %arg7: memref<1x8x5xf32, #tpu.memory_space<vmem>>, %arg8: memref<1x5x1xf32, #tpu.memory_space<vmem>>, %arg9: memref<1x5x256xf32, #tpu.memory_space<vmem>>, %arg10: memref<1x2x40x256xf32, #tpu.memory_space<vmem>>) attributes {dimension_semantics = [#tpu.dimension_semantics<parallel>, #tpu.dimension_semantics<parallel>, #tpu.dimension_semantics<arbitrary>], iteration_bounds = array<i64: 2, 4, 1>, scalar_prefetch = 0 : i64, scratch_operands = 0 : i64, tpu.core_type = #tpu.core_type<tc>, window_params = [{transform_indices = @transform_0, window_bounds = array<i64: 1, 8, 256>}, {pipeline_mode = #tpu.pipeline_mode<synchronous>, transform_indices = @transform_1, window_bounds = array<i64: 8, 8>}, {pipeline_mode = #tpu.pipeline_mode<synchronous>, transform_indices = @transform_2, window_bounds = array<i64: 8, 1>}, {transform_indices = @transform_3, window_bounds = array<i64: 1, 5, 8>}, {transform_indices = @transform_4, window_bounds = array<i64: 1, 8, 5>}, {transform_indices = @transform_5, window_bounds = array<i64: 1, 5, 1>}, {transform_indices = @transform_6, window_bounds = array<i64: 1, 5, 256>}, {transform_indices = @transform_7, window_bounds = array<i64: 1, 2, 40, 256>}]} {
    %c0 = arith.constant 0 : index
    %c0_0 = arith.constant 0 : index
    %c0_1 = arith.constant 0 : index
    %0 = vector.load %arg3[%c0, %c0_0, %c0_1] : memref<1x8x256xf32, #tpu.memory_space<vmem>>, vector<1x8x256xf32>
    %1 = vector.shape_cast %0 : vector<1x8x256xf32> to vector<8x256xf32>
    %c0_2 = arith.constant 0 : index
    %c0_3 = arith.constant 0 : index
    %2 = vector.load %arg4[%c0_2, %c0_3] : memref<8x8xf32, #tpu.memory_space<vmem>>, vector<8x8xf32>
    %cst = arith.constant dense<0.000000e+00> : vector<8x256xf32>
    %3 = tpu.matmul %2, %1, %cst {dimension_numbers = #tpu.dot_dimension_numbers<[1], [0], [0], [1], [0, 0, 1, 1], [], []>, precision = #tpu.contract_precision<fp32>} : vector<8x8xf32>, vector<8x256xf32>, vector<8x256xf32> -> vector<8x256xf32>
    %4 = arith.mulf %1, %1 : vector<8x256xf32>
    %cst_4 = arith.constant dense<0.000000e+00> : vector<256xf32>
    %5 = vector.multi_reduction <add>, %4, %cst_4 [0] : vector<8x256xf32> to vector<256xf32>
    %6 = vector.shape_cast %5 : vector<256xf32> to vector<1x256xf32>
    %cst_5 = arith.constant 5.917160e-01 : f32
    %7 = vector.broadcast %cst_5 : f32 to vector<8x256xf32>
    %8 = arith.mulf %3, %7 : vector<8x256xf32>
    %cst_6 = arith.constant 2.958580e-01 : f32
    %9 = vector.broadcast %cst_6 : f32 to vector<1x256xf32>
    %10 = arith.mulf %6, %9 : vector<1x256xf32>
    %11 = vector.broadcast %10 : vector<1x256xf32> to vector<8x256xf32>
    %12 = arith.subf %8, %11 : vector<8x256xf32>
    %c0_7 = arith.constant 0 : index
    %c0_8 = arith.constant 0 : index
    %13 = vector.load %arg5[%c0_7, %c0_8] : memref<8x1xf32, #tpu.memory_space<vmem>>, vector<8x1xf32>
    %14 = vector.broadcast %13 : vector<8x1xf32> to vector<8x256xf32>
    %15 = arith.subf %12, %14 : vector<8x256xf32>
    %cst_9 = arith.constant dense<0xFF800000> : vector<256xf32>
    %16 = vector.multi_reduction <maximumf>, %15, %cst_9 [0] : vector<8x256xf32> to vector<256xf32>
    %17 = vector.shape_cast %16 : vector<256xf32> to vector<1x256xf32>
    %18 = vector.broadcast %17 : vector<1x256xf32> to vector<8x256xf32>
    %19 = arith.subf %15, %18 : vector<8x256xf32>
    %20 = math.exp %19 : vector<8x256xf32>
    %cst_10 = arith.constant dense<0.000000e+00> : vector<256xf32>
    %21 = vector.multi_reduction <add>, %20, %cst_10 [0] : vector<8x256xf32> to vector<256xf32>
    %22 = vector.shape_cast %21 : vector<256xf32> to vector<1x256xf32>
    %cst_11 = arith.constant 1.000000e+00 : f32
    %23 = vector.broadcast %cst_11 : f32 to vector<1x256xf32>
    %24 = arith.divf %23, %22 : vector<1x256xf32>
    %c0_i32 = arith.constant 0 : i32
    %25 = arith.cmpi eq, %arg2, %c0_i32 : i32
    %26 = arith.extui %25 : i1 to i32
    %c0_i32_12 = arith.constant 0 : i32
    %27 = arith.cmpi ne, %26, %c0_i32_12 : i32
    scf.if %27 {
      %129 = vector.extract_strided_slice %20 {offsets = [0, 0], sizes = [5, 256], strides = [1, 1]} : vector<8x256xf32> to vector<5x256xf32>
      %130 = vector.broadcast %24 : vector<1x256xf32> to vector<5x256xf32>
      %131 = arith.mulf %129, %130 : vector<5x256xf32>
      %c0_59 = arith.constant 0 : index
      %c0_60 = arith.constant 0 : index
      %c0_61 = arith.constant 0 : index
      %132 = vector.load %arg9[%c0_59, %c0_60, %c0_61] : memref<1x5x256xf32, #tpu.memory_space<vmem>>, vector<1x5x256xf32>
      %133 = vector.shape_cast %132 : vector<1x5x256xf32> to vector<5x256xf32>
      %134 = vector.shape_cast %131 : vector<5x256xf32> to vector<1x5x256xf32>
      tpu.vector_store %arg9[%c0_59, %c0_60, %c0_61], %134 {strides = array<i32>} : memref<1x5x256xf32, #tpu.memory_space<vmem>>, vector<1x5x256xf32>,
    } else {
    }
    %28 = vector.extract_strided_slice %20 {offsets = [0, 0], sizes = [5, 256], strides = [1, 1]} : vector<8x256xf32> to vector<5x256xf32>
    %29 = vector.broadcast %24 : vector<1x256xf32> to vector<5x256xf32>
    %30 = arith.mulf %28, %29 : vector<5x256xf32>
    %cst_13 = arith.constant 1.41421354 : f32
    %31 = vector.broadcast %cst_13 : f32 to vector<5x256xf32>
    %32 = arith.mulf %30, %31 : vector<5x256xf32>
    %cst_14 = arith.constant 1.000000e+00 : f32
    %33 = vector.broadcast %cst_14 : f32 to vector<5x256xf32>
    %34 = arith.mulf %30, %33 : vector<5x256xf32>
    %cst_15 = arith.constant 0.769230782 : f32
    %35 = vector.broadcast %cst_15 : f32 to vector<8x256xf32>
    %36 = arith.mulf %1, %35 : vector<8x256xf32>
    %c0_16 = arith.constant 0 : index
    %c0_17 = arith.constant 0 : index
    %c0_18 = arith.constant 0 : index
    %37 = vector.load %arg7[%c0_16, %c0_17, %c0_18] : memref<1x8x5xf32, #tpu.memory_space<vmem>>, vector<1x8x5xf32>
    %38 = vector.shape_cast %37 : vector<1x8x5xf32> to vector<8x5xf32>
    %39 = vector.extract_strided_slice %38 {offsets = [0, 0], sizes = [8, 1], strides = [1, 1]} : vector<8x5xf32> to vector<8x1xf32>
    %40 = vector.broadcast %39 : vector<8x1xf32> to vector<8x256xf32>
    %41 = arith.subf %36, %40 : vector<8x256xf32>
    %42 = vector.extract_strided_slice %32 {offsets = [0, 0], sizes = [1, 256], strides = [1, 1]} : vector<5x256xf32> to vector<1x256xf32>
    %43 = vector.broadcast %42 : vector<1x256xf32> to vector<8x256xf32>
    %44 = arith.mulf %41, %43 : vector<8x256xf32>
    %c0_19 = arith.constant 0 : index
    %c0_20 = arith.constant 0 : index
    %c0_21 = arith.constant 0 : index
    %c0_22 = arith.constant 0 : index
    %45 = vector.load %arg10[%c0_19, %c0_20, %c0_21, %c0_22] : memref<1x2x40x256xf32, #tpu.memory_space<vmem>>, vector<1x1x8x256xf32>
    %46 = vector.shape_cast %45 : vector<1x1x8x256xf32> to vector<8x256xf32>
    %47 = vector.shape_cast %44 : vector<8x256xf32> to vector<1x1x8x256xf32>
    tpu.vector_store %arg10[%c0_19, %c0_20, %c0_21, %c0_22], %47 {strides = array<i32>} : memref<1x2x40x256xf32, #tpu.memory_space<vmem>>, vector<1x1x8x256xf32>,
    %48 = arith.mulf %41, %41 : vector<8x256xf32>
    %cst_23 = arith.constant 1.000000e+00 : f32
    %49 = vector.broadcast %cst_23 : f32 to vector<8x256xf32>
    %50 = arith.subf %48, %49 : vector<8x256xf32>
    %51 = vector.extract_strided_slice %34 {offsets = [0, 0], sizes = [1, 256], strides = [1, 1]} : vector<5x256xf32> to vector<1x256xf32>
    %52 = vector.broadcast %51 : vector<1x256xf32> to vector<8x256xf32>
    %53 = arith.mulf %50, %52 : vector<8x256xf32>
    %c0_24 = arith.constant 0 : index
    %c1 = arith.constant 1 : index
    %c0_25 = arith.constant 0 : index
    %c0_26 = arith.constant 0 : index
    %54 = vector.load %arg10[%c0_24, %c1, %c0_25, %c0_26] : memref<1x2x40x256xf32, #tpu.memory_space<vmem>>, vector<1x1x8x256xf32>
    %55 = vector.shape_cast %54 : vector<1x1x8x256xf32> to vector<8x256xf32>
    %56 = vector.shape_cast %53 : vector<8x256xf32> to vector<1x1x8x256xf32>
    tpu.vector_store %arg10[%c0_24, %c1, %c0_25, %c0_26], %56 {strides = array<i32>} : memref<1x2x40x256xf32, #tpu.memory_space<vmem>>, vector<1x1x8x256xf32>,
    %57 = vector.extract_strided_slice %38 {offsets = [0, 1], sizes = [8, 1], strides = [1, 1]} : vector<8x5xf32> to vector<8x1xf32>
    %58 = vector.broadcast %57 : vector<8x1xf32> to vector<8x256xf32>
    %59 = arith.subf %36, %58 : vector<8x256xf32>
    %60 = vector.extract_strided_slice %32 {offsets = [1, 0], sizes = [1, 256], strides = [1, 1]} : vector<5x256xf32> to vector<1x256xf32>
    %61 = vector.broadcast %60 : vector<1x256xf32> to vector<8x256xf32>
    %62 = arith.mulf %59, %61 : vector<8x256xf32>
    %c0_27 = arith.constant 0 : index
    %c0_28 = arith.constant 0 : index
    %c8 = arith.constant 8 : index
    %c0_29 = arith.constant 0 : index
    %63 = vector.load %arg10[%c0_27, %c0_28, %c8, %c0_29] : memref<1x2x40x256xf32, #tpu.memory_space<vmem>>, vector<1x1x8x256xf32>
    %64 = vector.shape_cast %63 : vector<1x1x8x256xf32> to vector<8x256xf32>
    %65 = vector.shape_cast %62 : vector<8x256xf32> to vector<1x1x8x256xf32>
    tpu.vector_store %arg10[%c0_27, %c0_28, %c8, %c0_29], %65 {strides = array<i32>} : memref<1x2x40x256xf32, #tpu.memory_space<vmem>>, vector<1x1x8x256xf32>,
    %66 = arith.mulf %59, %59 : vector<8x256xf32>
    %cst_30 = arith.constant 1.000000e+00 : f32
    %67 = vector.broadcast %cst_30 : f32 to vector<8x256xf32>
    %68 = arith.subf %66, %67 : vector<8x256xf32>
    %69 = vector.extract_strided_slice %34 {offsets = [1, 0], sizes = [1, 256], strides = [1, 1]} : vector<5x256xf32> to vector<1x256xf32>
    %70 = vector.broadcast %69 : vector<1x256xf32> to vector<8x256xf32>
    %71 = arith.mulf %68, %70 : vector<8x256xf32>
    %c0_31 = arith.constant 0 : index
    %c1_32 = arith.constant 1 : index
    %c8_33 = arith.constant 8 : index
    %c0_34 = arith.constant 0 : index
    %72 = vector.load %arg10[%c0_31, %c1_32, %c8_33, %c0_34] : memref<1x2x40x256xf32, #tpu.memory_space<vmem>>, vector<1x1x8x256xf32>
    %73 = vector.shape_cast %72 : vector<1x1x8x256xf32> to vector<8x256xf32>
    %74 = vector.shape_cast %71 : vector<8x256xf32> to vector<1x1x8x256xf32>
    tpu.vector_store %arg10[%c0_31, %c1_32, %c8_33, %c0_34], %74 {strides = array<i32>} : memref<1x2x40x256xf32, #tpu.memory_space<vmem>>, vector<1x1x8x256xf32>,
    %75 = vector.extract_strided_slice %38 {offsets = [0, 2], sizes = [8, 1], strides = [1, 1]} : vector<8x5xf32> to vector<8x1xf32>
    %76 = vector.broadcast %75 : vector<8x1xf32> to vector<8x256xf32>
    %77 = arith.subf %36, %76 : vector<8x256xf32>
    %78 = vector.extract_strided_slice %32 {offsets = [2, 0], sizes = [1, 256], strides = [1, 1]} : vector<5x256xf32> to vector<1x256xf32>
    %79 = vector.broadcast %78 : vector<1x256xf32> to vector<8x256xf32>
    %80 = arith.mulf %77, %79 : vector<8x256xf32>
    %c0_35 = arith.constant 0 : index
    %c0_36 = arith.constant 0 : index
    %c16 = arith.constant 16 : index
    %c0_37 = arith.constant 0 : index
    %81 = vector.load %arg10[%c0_35, %c0_36, %c16, %c0_37] : memref<1x2x40x256xf32, #tpu.memory_space<vmem>>, vector<1x1x8x256xf32>
    %82 = vector.shape_cast %81 : vector<1x1x8x256xf32> to vector<8x256xf32>
    %83 = vector.shape_cast %80 : vector<8x256xf32> to vector<1x1x8x256xf32>
    tpu.vector_store %arg10[%c0_35, %c0_36, %c16, %c0_37], %83 {strides = array<i32>} : memref<1x2x40x256xf32, #tpu.memory_space<vmem>>, vector<1x1x8x256xf32>,
    %84 = arith.mulf %77, %77 : vector<8x256xf32>
    %cst_38 = arith.constant 1.000000e+00 : f32
    %85 = vector.broadcast %cst_38 : f32 to vector<8x256xf32>
    %86 = arith.subf %84, %85 : vector<8x256xf32>
    %87 = vector.extract_strided_slice %34 {offsets = [2, 0], sizes = [1, 256], strides = [1, 1]} : vector<5x256xf32> to vector<1x256xf32>
    %88 = vector.broadcast %87 : vector<1x256xf32> to vector<8x256xf32>
    %89 = arith.mulf %86, %88 : vector<8x256xf32>
    %c0_39 = arith.constant 0 : index
    %c1_40 = arith.constant 1 : index
    %c16_41 = arith.constant 16 : index
    %c0_42 = arith.constant 0 : index
    %90 = vector.load %arg10[%c0_39, %c1_40, %c16_41, %c0_42] : memref<1x2x40x256xf32, #tpu.memory_space<vmem>>, vector<1x1x8x256xf32>
    %91 = vector.shape_cast %90 : vector<1x1x8x256xf32> to vector<8x256xf32>
    %92 = vector.shape_cast %89 : vector<8x256xf32> to vector<1x1x8x256xf32>
    tpu.vector_store %arg10[%c0_39, %c1_40, %c16_41, %c0_42], %92 {strides = array<i32>} : memref<1x2x40x256xf32, #tpu.memory_space<vmem>>, vector<1x1x8x256xf32>,
    %93 = vector.extract_strided_slice %38 {offsets = [0, 3], sizes = [8, 1], strides = [1, 1]} : vector<8x5xf32> to vector<8x1xf32>
    %94 = vector.broadcast %93 : vector<8x1xf32> to vector<8x256xf32>
    %95 = arith.subf %36, %94 : vector<8x256xf32>
    %96 = vector.extract_strided_slice %32 {offsets = [3, 0], sizes = [1, 256], strides = [1, 1]} : vector<5x256xf32> to vector<1x256xf32>
    %97 = vector.broadcast %96 : vector<1x256xf32> to vector<8x256xf32>
    %98 = arith.mulf %95, %97 : vector<8x256xf32>
    %c0_43 = arith.constant 0 : index
    %c0_44 = arith.constant 0 : index
    %c24 = arith.constant 24 : index
    %c0_45 = arith.constant 0 : index
    %99 = vector.load %arg10[%c0_43, %c0_44, %c24, %c0_45] : memref<1x2x40x256xf32, #tpu.memory_space<vmem>>, vector<1x1x8x256xf32>
    %100 = vector.shape_cast %99 : vector<1x1x8x256xf32> to vector<8x256xf32>
    %101 = vector.shape_cast %98 : vector<8x256xf32> to vector<1x1x8x256xf32>
    tpu.vector_store %arg10[%c0_43, %c0_44, %c24, %c0_45], %101 {strides = array<i32>} : memref<1x2x40x256xf32, #tpu.memory_space<vmem>>, vector<1x1x8x256xf32>,
    %102 = arith.mulf %95, %95 : vector<8x256xf32>
    %cst_46 = arith.constant 1.000000e+00 : f32
    %103 = vector.broadcast %cst_46 : f32 to vector<8x256xf32>
    %104 = arith.subf %102, %103 : vector<8x256xf32>
    %105 = vector.extract_strided_slice %34 {offsets = [3, 0], sizes = [1, 256], strides = [1, 1]} : vector<5x256xf32> to vector<1x256xf32>
    %106 = vector.broadcast %105 : vector<1x256xf32> to vector<8x256xf32>
    %107 = arith.mulf %104, %106 : vector<8x256xf32>
    %c0_47 = arith.constant 0 : index
    %c1_48 = arith.constant 1 : index
    %c24_49 = arith.constant 24 : index
    %c0_50 = arith.constant 0 : index
    %108 = vector.load %arg10[%c0_47, %c1_48, %c24_49, %c0_50] : memref<1x2x40x256xf32, #tpu.memory_space<vmem>>, vector<1x1x8x256xf32>
    %109 = vector.shape_cast %108 : vector<1x1x8x256xf32> to vector<8x256xf32>
    %110 = vector.shape_cast %107 : vector<8x256xf32> to vector<1x1x8x256xf32>
    tpu.vector_store %arg10[%c0_47, %c1_48, %c24_49, %c0_50], %110 {strides = array<i32>} : memref<1x2x40x256xf32, #tpu.memory_space<vmem>>, vector<1x1x8x256xf32>,
    %111 = vector.extract_strided_slice %38 {offsets = [0, 4], sizes = [8, 1], strides = [1, 1]} : vector<8x5xf32> to vector<8x1xf32>
    %112 = vector.broadcast %111 : vector<8x1xf32> to vector<8x256xf32>
    %113 = arith.subf %36, %112 : vector<8x256xf32>
    %114 = vector.extract_strided_slice %32 {offsets = [4, 0], sizes = [1, 256], strides = [1, 1]} : vector<5x256xf32> to vector<1x256xf32>
    %115 = vector.broadcast %114 : vector<1x256xf32> to vector<8x256xf32>
    %116 = arith.mulf %113, %115 : vector<8x256xf32>
    %c0_51 = arith.constant 0 : index
    %c0_52 = arith.constant 0 : index
    %c32 = arith.constant 32 : index
    %c0_53 = arith.constant 0 : index
    %117 = vector.load %arg10[%c0_51, %c0_52, %c32, %c0_53] : memref<1x2x40x256xf32, #tpu.memory_space<vmem>>, vector<1x1x8x256xf32>
    %118 = vector.shape_cast %117 : vector<1x1x8x256xf32> to vector<8x256xf32>
    %119 = vector.shape_cast %116 : vector<8x256xf32> to vector<1x1x8x256xf32>
    tpu.vector_store %arg10[%c0_51, %c0_52, %c32, %c0_53], %119 {strides = array<i32>} : memref<1x2x40x256xf32, #tpu.memory_space<vmem>>, vector<1x1x8x256xf32>,
    %120 = arith.mulf %113, %113 : vector<8x256xf32>
    %cst_54 = arith.constant 1.000000e+00 : f32
    %121 = vector.broadcast %cst_54 : f32 to vector<8x256xf32>
    %122 = arith.subf %120, %121 : vector<8x256xf32>
    %123 = vector.extract_strided_slice %34 {offsets = [4, 0], sizes = [1, 256], strides = [1, 1]} : vector<5x256xf32> to vector<1x256xf32>
    %124 = vector.broadcast %123 : vector<1x256xf32> to vector<8x256xf32>
    %125 = arith.mulf %122, %124 : vector<8x256xf32>
    %c0_55 = arith.constant 0 : index
    %c1_56 = arith.constant 1 : index
    %c32_57 = arith.constant 32 : index
    %c0_58 = arith.constant 0 : index
    %126 = vector.load %arg10[%c0_55, %c1_56, %c32_57, %c0_58] : memref<1x2x40x256xf32, #tpu.memory_space<vmem>>, vector<1x1x8x256xf32>
    %127 = vector.shape_cast %126 : vector<1x1x8x256xf32> to vector<8x256xf32>
    %128 = vector.shape_cast %125 : vector<8x256xf32> to vector<1x1x8x256xf32>
    tpu.vector_store %arg10[%c0_55, %c1_56, %c32_57, %c0_58], %128 {strides = array<i32>} : memref<1x2x40x256xf32, #tpu.memory_space<vmem>>, vector<1x1x8x256xf32>,
    return
  }
  func.func @transform_0(%arg0: i32, %arg1: i32, %arg2: i32) -> (i32, i32, i32) {
    %c0_i32 = arith.constant 0 : i32
    %c0_i32_0 = arith.constant 0 : i32
    return %arg0, %c0_i32, %arg1 : i32, i32, i32
  }
  func.func @transform_1(%arg0: i32, %arg1: i32, %arg2: i32) -> (i32, i32) {
    %c0_i32 = arith.constant 0 : i32
    %c0_i32_0 = arith.constant 0 : i32
    %c0_i32_1 = arith.constant 0 : i32
    return %c0_i32, %c0_i32_0 : i32, i32
  }
  func.func @transform_2(%arg0: i32, %arg1: i32, %arg2: i32) -> (i32, i32) {
    %c0_i32 = arith.constant 0 : i32
    %c0_i32_0 = arith.constant 0 : i32
    %c0_i32_1 = arith.constant 0 : i32
    return %c0_i32, %c0_i32_0 : i32, i32
  }
  func.func @transform_3(%arg0: i32, %arg1: i32, %arg2: i32) -> (i32, i32, i32) {
    %c0_i32 = arith.constant 0 : i32
    %c0_i32_0 = arith.constant 0 : i32
    %c0_i32_1 = arith.constant 0 : i32
    return %arg2, %c0_i32, %c0_i32_0 : i32, i32, i32
  }
  func.func @transform_4(%arg0: i32, %arg1: i32, %arg2: i32) -> (i32, i32, i32) {
    %c0_i32 = arith.constant 0 : i32
    %c0_i32_0 = arith.constant 0 : i32
    %c0_i32_1 = arith.constant 0 : i32
    return %arg2, %c0_i32, %c0_i32_0 : i32, i32, i32
  }
  func.func @transform_5(%arg0: i32, %arg1: i32, %arg2: i32) -> (i32, i32, i32) {
    %c0_i32 = arith.constant 0 : i32
    %c0_i32_0 = arith.constant 0 : i32
    %c0_i32_1 = arith.constant 0 : i32
    return %arg2, %c0_i32, %c0_i32_0 : i32, i32, i32
  }
  func.func @transform_6(%arg0: i32, %arg1: i32, %arg2: i32) -> (i32, i32, i32) {
    %c0_i32 = arith.constant 0 : i32
    %c0_i32_0 = arith.constant 0 : i32
    return %arg0, %c0_i32, %arg1 : i32, i32, i32
  }
  func.func @transform_7(%arg0: i32, %arg1: i32, %arg2: i32) -> (i32, i32, i32, i32) {
    %c0_i32 = arith.constant 0 : i32
    %c0_i32_0 = arith.constant 0 : i32
    return %arg0, %c0_i32, %arg2, %arg1 : i32, i32, i32, i32
  }
}

</mosaic_0001>

<bundles_post_ra>
// kernel: tpu_custom_call.1
= control target key start
LH: loop header
LB: loop body
LE: loop exit
PB: predicated region body
PF: predicated region fallthrough
CT: control target
= control target key end

     0   :  { %13 = vsyncpa [#allocation3], 0  ;;  %s1694_s0 = inlined_call_operand.hbm [shape: f32[2,8,1024], index: 0, kind: input, shape index: {}]   ;;  %s1695_s1 = inlined_call_operand.vmem [shape: f32[8,8], index: 1, kind: input, shape index: {}]   ;;  %s1696_s2 = inlined_call_operand.vmem [shape: f32[8,1], index: 2, kind: input, shape index: {}]   ;;  %s1697_s3 = inlined_call_operand.vmem [shape: f32[1,5,8], index: 3, kind: input, shape index: {}]   ;;  %s1698_s4 = inlined_call_operand.vmem [shape: f32[1,8,5], index: 4, kind: input, shape index: {}]   ;;  %s1699_s5 = inlined_call_operand.vmem [shape: f32[1,5,1], index: 5, kind: input, shape index: {}]   ;;  %s1700_s6 = inlined_call_operand.vmem [shape: f32[2,5,1024], index: 6, kind: output, shape index: {0}]   ;;  %s1701_s7 = inlined_call_operand.hbm [shape: f32[2,2,40,1024], index: 7, kind: output, shape index: {1}]  }
   0x1   :  { %15 = vsyncpa [#allocation3 + $0x1], 0 }
   0x2   :  { %16 = vsyncpa [#allocation4], 0 }
   0x3   :  { %18 = vsyncpa [#allocation4 + $0x1], 0  ;;  %s1447_s24 = smov 0   ;;  %s1449_s25 = smov 0  }
   0x4   :  { %s1451_s3 = smov 0   ;;  %s1453_s26 = smov 0  }
   0x5   :  { %s1455_s27 = smov 0   ;;  %s1457_s5 = smov 0  }
   0x6   :  { %s1459_s28 = smov 0   ;;  %s1461_s29 = smov 0  }
   0x7 LB: > { %s1127_s30 = sadd.s32 4294967295, %s1397_s29   ;;  %s1128_s8 = sadd.s32 4294967294, %s1397_s29   ;;  %s1397_s29 = sphi %s1461_s29, %s24_s29   ;;  %s1393_s28 = sphi %s1459_s28, %s1721_s28   ;;  %s1389_s5 = sphi %s1457_s5, %s1720_s5   ;;  %s1385_s27 = sphi %s1455_s27, %s1719_s27   ;;  %s1381_s26 = sphi %s1453_s26, %s1718_s26   ;;  %s1377_s3 = sphi %s1451_s3, %s1717_s3   ;;  %s1373_s25 = sphi %s1449_s25, %s1716_s25   ;;  %s1369_s24 = sphi %s1447_s24, %s1715_s24  }
   0x8   : > { %s39_s9 = sadd.s32 1, %s1389_s5  ;;  %s43_s10 = sadd.s32 1, %s1393_s28 }
   0x9   : > { %p41_p0 = scmp.ge.s32.totalorder %s39_s9, 4  ;;  %s52_s11 = sadd.s32 1, %s1377_s3 }
   0xa   : > { %p59_p1 = scmp.ne.s32.totalorder %s1377_s3, %s1373_s25  ;;  %p60_p2 = scmp.eq.s32.totalorder %s1397_s29, 0 }
   0xb   : > { %s1723_s9 = smov (%p41_p0, %s39_s9), 0  ;;  %s1725_s10 = smov (!%p41_p0, %s43_s10), %s1393_s28 }
   0xc   : > { %1705 = sst [smem:[#allocation8_spill]] %s1723_s9  ;;  %s48_s12 = ssub.s32 %s1389_s5, %s1723_s9 }
   0xd   : > { %p1500_p3 = por %p60_p2, %p59_p1  ;;  %p45_p4 = scmp.ge.s32.totalorder %s1725_s10, 2 }
   0xe   : > { %p65_p5 = scmp.ne.s32.totalorder %s1373_s25, %s1369_s24  ;;  %p66_p6 = scmp.eq.s32.totalorder %s1127_s30, 0 }
   0xf   : > { %p241_p7 = scmp.eq.s32.totalorder %s1127_s30, 7  ;;  %s1727_s10 = smov (%p45_p4, %s1725_s10), 0 }
  0x10   : > { %1707 = sst [smem:[#allocation9_spill]] %s1727_s10  ;;  %p1508_p8 = por %p66_p6, %p65_p5 }
  0x11   : > { %p1512_p9 = por %p241_p7, %p59_p1  ;;  %s47_s16 = ssub.s32 %s1393_s28, %s1727_s10 }
  0x12   : > { %p247_p10 = scmp.eq.s32.totalorder %s1128_s8, 7  ;;  %s49_s17 = sor.u32 %s48_s12, %s47_s16 }
  0x13   : > { %p50_p11 = scmp.eq.s32.totalorder %s49_s17, 0  ;;  %p1181_p13 = scmp.lt.s32.totalorder %s1397_s29, 8 }
  0x14   : > { %p1518_p12 = por %p247_p10, %p65_p5  ;;  %s294_s19 = sand.u32 1, %s1377_s3  }
  0x15   : > { %s1525_s20 = scalar_select %p50_p11, %s1377_s3, %s52_s11  }
  0x16   : > { %s1710_s18 = scalar_select %p1518_p12, 1, 0 }
  0x17   : > { %s1134_s21 = sshll.u32 %s294_s19, 4  ;;  %s1135_s22 = sshll.u32 %s1389_s5, 1 }
  0x18   : > { %1711 = sst [smem:[#allocation10_spill]] %s1710_s18  ;;  %s1136_s23 = sshll.u32 %s1393_s28, 3 }
  0x19   : > { %s298_s30 = scalar_lea.vmem [#allocation2], %s1134_s21  ;;  %s303_s10 = sadd.s32 %s1136_s23, %s1135_s22 }
  0x1a   : > { %s309_s9 = sshll.u32 %s298_s30, 4  ;;  %s1137_s8 = sshll.u32 %s303_s10, 3  ;;  %s310_s9 = int_to_ptr.vmem [resolvable:$true] %s309_s9 }
  0x1b   : > { %p1174_p0 = pnand %p1181_p13, %p1500_p3  ;;  %s305_s17 = scalar_lea.hbm %s1694_s0, %s1137_s8 }
  0x1c   : > { %p1138_p1 = scmp.ge.s32.totalorder %s1397_s29, 1  ;;  %s307_s18 = sshll.u32 %s305_s17, 4  ;;  %s308_s18 = int_to_ptr.hbm [resolvable:$true] %s307_s18 }
  0x1d   : > { %p314_p2 = scmp.lt.s32.totalorder %s1397_s29, 9  ;;  %s295_s11 = scalar_lea.sflag [#allocation3], %s294_s19 }
  0x1e   : > { %1176 = dma.hbm_to_vmem [thread:$0]  (!%p1174_p0), %s308_s18, 256, %s310_s9, %s295_s11  }
  0x1f   : > { %p315_p4 = pnand %p1138_p1, %p314_p2 }
  0x20   : > { %s1537_s21 = sand.u32 (!%p315_p4), 1, %s1373_s25  }
  0x21   : > { %318 = sbr.rel (%p315_p4) target bundleno = 281 (0x119), region = 44  ;;  %s1139_s10 = sshll.u32 (!%p315_p4), %s1537_s21, 4 }
  0x22   : > { %s321_s13 = scalar_lea.sflag (!%p315_p4), [#allocation3], %s1537_s21  ;;  %s324_s22 = scalar_lea.vmem (!%p315_p4), [#allocation2], %s1139_s10 }
  0x26   : > { %1360 = dma.done.wait (%p1508_p8), %s321_s13, 256  }
  0x27   : > { %1362 = vsyncadd (%p1508_p8), %s321_s13, 4294967040  ;;  %v1399_v0 = vmov 0   ;;  %v1400_v1 = vmov 1   ;;  %vm405_vm0 = vcmask 64512   ;;  %v1401_v2 = vmov 3   ;;  %v1545_v3 = vld [vmem:[%s324_s22] sm:$0xff] }
  0x28   : > { %1255 = vset.pattern.permute.xlu0 %v1399_v0  ;;  %1256 = vset.pattern.permute.xlu1 %v1400_v1  ;;  %v404_v4 = vld [vmem:[%s1695_s1] sm:$0xff]  ;;  %v1550_v5 = vld [vmem:[%s324_s22 + $0x8] sm:$0xff]  ;;  %v424_v6 = vand.u32 4294901760, %v1545_v3  ;;  %v1402_v24 = vmov 2   ;;  %v1403_v25 = vmov 4   ;;  %v701_v26 = vmul.f32 %v1545_v3, %v1545_v3  ;;  %s1569_s8 = sshll.u32 %s1381_s26, 1 }
  0x29   : > { %1258 = vset.pattern.permute.xlu2 %v1401_v2  ;;  %v407_v7 = vsel %vm405_vm0, %v404_v4, 0  ;;  %v570_v8 = vand.u32 4294901760, %v1550_v5  ;;  %v721_v9 = vld [vmem:[%s1696_s2] sm:$0xff]  ;;  %v702_v30 = vmul.f32 %v1550_v5, %v1550_v5  ;;  %p391_p3 = scmp.lt.s32.totalorder %s1385_s27, 1  ;;  %p393_p5 = scmp.lt.s32.totalorder %s1569_s8, 7 }
  0x2a   : > { %v426_v10 = vand.u32 4294901760, %v407_v7  ;;  %724 = vperm.xlu0 %1255, %v721_v9   ;;  %v451_v11 = vsub.f32 %v1545_v3, %v424_v6  ;;  %501 = vmatpush.msra.mxu3 %v424_v6  ;;  %v803_v13 = vld [vmem:[%s1698_s4] sm:$0xff]  ;;  %v703_v27 = vrot.slane %v701_v26, 4  ;;  %s1167_s9 = smul.u32 160, %s1537_s21 }
  0x2b   : > { %425 = vmatpush.msra.mxu0 %v424_v6  ;;  %v597_v12 = vsub.f32 %v1550_v5, %v570_v8  ;;  %829 = vperm.xlu1 %1256, %v803_v13   ;;  %v709_v32 = vrot.slane %v702_v30, 4  ;;  %s392_s12 = scalar_select %p391_p3, %s1385_s27, 1 }
  0x2c   : > { %v427_v14 = vsub.f32 %v407_v7, %v426_v10  ;;  %873 = vperm.xlu2 %1258, %v803_v13   ;;  %478 = vmatpush.msra.mxu2 %v451_v11  ;;  %v452_v15 = vand.u32 4294901760, %v451_v11  ;;  %v704_v28 = vadd.f32 %v703_v27, %v701_v26  ;;  %s394_s16 = scalar_select %p393_p5, %s1569_s8, 7 }
  0x2d   : > { %v598_v16 = vand.u32 4294901760, %v597_v12  ;;  %v710_v40 = vadd.f32 %v709_v32, %v702_v30  ;;  %s1141_s17 = sshll.u32 %s392_s12, 3  ;;  %s1609_s18 = scalar_lea.vmem [#allocation5], %s1167_s9 }
  0x2e   : > { %481 = vmatmul.f32.vlgmr.msra.gmra.mxu2 %v427_v14  ;;  %v428_v17 = vand.u32 4294901760, %v427_v14  ;;  %v453_v18 = vsub.f32 %v451_v11, %v452_v15  ;;  %527 = vmatpush.msrb.mxu0 %v452_v15  ;;  %v705_v29 = vrot.slane %v704_v28, 2  ;;  %s396_s26 = sadd.s32 %s1141_s17, %s394_s16  ;;  %s1168_s14 = smul.u32 80, %s1385_s27 }
  0x2f   : > { %571 = vmatpush.msrb.mxu2 %v570_v8  ;;  %v599_v19 = vsub.f32 %v597_v12, %v598_v16  ;;  %v711_v43 = vrot.slane %v710_v40, 2  ;;  %s1142_s11 = sshll.u32 %s396_s26, 3  ;;  %s947_s16 = sshll.u32 %s1609_s18, 4  ;;  %s948_s16 = int_to_ptr.vmem [resolvable:$true] %s947_s16 }
  0x30   : > { %505 = vmatmul.f32.vlgmr.msra.gmra.mxu3 %v428_v17  ;;  %v429_v20 = vsub.f32 %v427_v14, %v428_v17  ;;  %v454_v21 = vand.u32 4294901760, %v453_v18  ;;  %v706_v31 = vadd.f32 %v705_v29, %v704_v28  ;;  %s1595_s22 = scalar_lea.vmem %s1700_s6, %s1142_s11  ;;  %s1627_s27 = sadd.s32 %s1168_s14, %s1569_s8 }
  0x31   : > { %673 = vmatpush.msra.mxu2 %v598_v16  ;;  %v600_v22 = vand.u32 4294901760, %v599_v19  ;;  %v712_v50 = vadd.f32 %v711_v43, %v710_v40  ;;  %s1164_s19 = sshll.u32 %s1627_s27, 3  ;;  %s926_s17 = scalar_lea.sflag [#allocation4], %s1537_s21 }
  0x32   : > { %v430_v23 = vand.u32 4294901760, %v429_v20  ;;  %806 = vperm.xlu0 %1255, %v803_v13   ;;  %455 = vmatpush.msra.mxu1 %v454_v21  ;;  %v707_v39 = vrot.slane %v706_v31, 1  ;;  %s946_s8 = scalar_lea.hbm %s1701_s7, %s1164_s19 }
  0x33   : > { %601 = vmatpush.msrb.mxu3 %v600_v22  ;;  %457 = vmatmul.f32.vlgmr.msra.gmra.mxu1 %v426_v10  ;;  %v713_v56 = vrot.slane %v712_v50, 1  ;;  %s949_s12 = sshll.u32 %s946_s8, 4  ;;  %s950_s12 = int_to_ptr.hbm [resolvable:$true] %s949_s12 }
  0x34   : > { %431 = vmatmul.f32.vlgmr.msra.gmra.mxu0 %v430_v23  ;;  %549 = vmatpush.msrb.mxu1 %v424_v6  ;;  %v708_v42 = vadd.f32 %v707_v39, %v706_v31  ;;  %v801_v39 = vmul.f32 0.7692308, %v1545_v3  ;;  %s1313_s26 = sshra.s32 %s950_s12, 4  ;;  %s1314_s26 = int_to_ptr.hbm [resolvable:$true] %s1313_s26 }
  0x35   : > { %624 = vmatpush.msra.mxu0 %v597_v12  ;;  %695 = vmatpush.msra.mxu3 %v570_v8  ;;  %v714_v0 = vadd.f32 %v713_v56, %v712_v50  ;;  %s1315_s11 = scalar_lea.hbm %s1314_s26, 160  ;;  %p1320_p10 = scmp.lt.s32.totalorder %s1314_s26, %s1701_s7 }
  0x36   : > { %577 = vmatmul.f32.vlgmr.msrb.gmra.mxu2 %v430_v23  ;;  %647 = vmatpush.msra.mxu1 %v570_v8  ;;  %v717_v49 = vmul.f32 0.295858, %v708_v42  ;;  %p1316_p6 = scmp.ne.s32.totalorder %s1314_s26, %s1315_s11 }
  0x37   : > { %1257 = vset.pattern.permute.xlu1 %v1402_v24  ;;  %1259 = vset.pattern.permute.xlu2 %v1403_v25  ;;  %v718_v8 = vmul.f32 0.295858, %v714_v0 }
  0x38   : > { %603 = vmatmul.f32.vlgmr.msrb.gmra.mxu3 %v426_v10  ;;  %851 = vperm.xlu1 %1257, %v803_v13   ;;  %p1317_p7 = pnand %p1316_p6, %p1512_p9 }
  0x39   : > { %895 = vperm.xlu2 %1259, %v803_v13  }
  0x3a   : > { %1260 = vset.pattern.permute.xlu0 %v1403_v25  ;;  %p1318_p8 = pneg %p1317_p7 }
  0x3b   : > { %551 = vmatmul.f32.vlgmr.msrb.gmra.mxu1 %v426_v10 }
  0x3c   : > { %529 = vmatmul.f32.vlgmr.msrb.gmra.mxu0 %v426_v10 }
  0x3e   : > { %675 = vmatmul.f32.vlgmr.msra.gmra.mxu2 %v426_v10 }
  0x40   : > { %697 = vmatmul.f32.vlgmr.msra.gmra.mxu3 %v426_v10 }
  0x43   : > { %651 = vmatmul.f32.vlgmr.msra.gmra.mxu1 %v428_v17 }
  0x44   : > { %627 = vmatmul.f32.vlgmr.msra.gmra.mxu0 %v427_v14 }
  0x86   : > { %v874_v31 = vpop.permute.xlu2 %873 }
  0x93   : > { %v1580_v43 = vpop.permute.xlu2 %895 }
  0x94   : > { %v898_v50 = vsub.f32 %v801_v39, %v1580_v43 }
  0x9c   : > { %v725_v53 = vpop.permute.xlu0 %724 }
  0xa4   : > { %v807_v42 = vpop.permute.xlu0 %806 }
  0xb0   : > { %v458_v34 = vpop.f32.mrf.mxu1 }
  0xb1   : > { %v432_v33 = vpop.f32.mrf.mxu0  ;;  %v482_v36 = vpop.f32.mrf.mxu2 }
  0xb2   : > { %v459_v35 = vadd.f32 %v458_v34, %v432_v33 }
  0xb3   : > { %v506_v37 = vpop.f32.mrf.mxu3 }
  0xb4   : > { %v483_v38 = vadd.f32 %v482_v36, %v459_v35  ;;  %v1576_v36 = vpop.permute.xlu1 %829 }
  0xb6   : > { %v507_v41 = vadd.f32 %v506_v37, %v483_v38 }
  0xb8   : > { %v552_v45 = vpop.f32.mrf.mxu1 }
  0xb9   : > { %v530_v44 = vpop.f32.mrf.mxu0  ;;  %v578_v47 = vpop.f32.mrf.mxu2 }
  0xba   : > { %v531_v46 = vadd.f32 %v530_v44, %v507_v41 }
  0xbb   : > { %v604_v51 = vpop.f32.mrf.mxu3 }
  0xbc   : > { %v553_v48 = vadd.f32 %v552_v45, %v531_v46  ;;  %v605_v55 = vadd.f32 %v604_v51, %v578_v47  ;;  %v876_v46 = vsub.f32 %v801_v39, %v874_v31 }
  0xbe   : > { %v715_v52 = vmul.f32 0.591716, %v553_v48  ;;  %v809_v48 = vsub.f32 %v801_v39, %v807_v42 }
  0xc0   : > { %v719_v54 = vsub.f32 %v715_v52, %v717_v49  ;;  %v652_v58 = vpop.f32.mrf.mxu1  ;;  %v832_v49 = vsub.f32 %v801_v39, %v1576_v36 }
  0xc1   : > { %v628_v57 = vpop.f32.mrf.mxu0  ;;  %v676_v61 = vpop.f32.mrf.mxu2 }
  0xc2   : > { %v727_v59 = vsub.f32 %v719_v54, %v725_v53  ;;  %v629_v60 = vadd.f32 %v628_v57, %v605_v55  ;;  %v884_v54 = vmul.f32 %v876_v46, %v876_v46  ;;  %v1587_v55 = vpop.permute.xlu1 %851  ;;  %v1590_v57 = vmul.f32 0.7692308, %v1550_v5 }
  0xc3   : > { %v698_v1 = vpop.f32.mrf.mxu3 }
  0xc4   : > { %v729_v62 = vrot.slane %v727_v59, 4  ;;  %v653_v63 = vadd.f32 %v652_v58, %v629_v60  ;;  %v817_v58 = vmul.f32 %v809_v48, %v809_v48  ;;  %v1600_v5 = vsub.f32 %v1590_v57, %v807_v42 }
  0xc6   : > { %v730_v2 = vmax.f32 %v727_v59, %v729_v62  ;;  %v677_v4 = vadd.f32 %v676_v61, %v653_v63  ;;  %v906_v61 = vmul.f32 %v898_v50, %v898_v50  ;;  %v854_v63 = vsub.f32 %v801_v39, %v1587_v55 }
  0xc8   : > { %v731_v6 = vrot.slane %v730_v2, 2  ;;  %v699_v7 = vadd.f32 %v698_v1, %v677_v4  ;;  %v1155_v1 = vadd.f32 -1.0, %v884_v54  ;;  %v1603_v4 = vsub.f32 %v1590_v57, %v874_v31 }
  0xc9   : > { %v833_v31 = vsub.f32 %v1590_v57, %v1576_v36  ;;  %v899_v36 = vsub.f32 %v1590_v57, %v1580_v43 }
  0xca   : > { %v732_v9 = vmax.f32 %v730_v2, %v731_v6  ;;  %v716_v10 = vmul.f32 0.591716, %v699_v7  ;;  %v1143_v2 = vadd.f32 -1.0, %v817_v58 }
  0xcc   : > { %v733_v11 = vrot.slane %v732_v9, 1  ;;  %v720_v12 = vsub.f32 %v716_v10, %v718_v8 }
  0xce   : > { %v734_v13 = vmax.f32 %v732_v9, %v733_v11  ;;  %v728_v14 = vsub.f32 %v720_v12, %v725_v53  ;;  %v1159_v11 = vadd.f32 -1.0, %v906_v61 }
  0xd0   : > { %v741_v15 = vsub.f32 %v727_v59, %v734_v13  ;;  %v735_v16 = vrot.slane %v728_v14, 4  ;;  %v840_v59 = vmul.f32 %v832_v49, %v832_v49 }
  0xd2   : > { %v743_v17 = vmul.f32 1.442695, %v741_v15  ;;  %v736_v18 = vmax.f32 %v728_v14, %v735_v16  ;;  %v1147_v6 = vadd.f32 -1.0, %v840_v59  ;;  %v862_v15 = vmul.f32 %v854_v63, %v854_v63 }
  0xd4   : > { %1261 = vpow2.f32 %v743_v17  ;;  %v737_v19 = vrot.slane %v736_v18, 2 }
  0xd6   : > { %v738_v20 = vmax.f32 %v736_v18, %v737_v19 }
  0xd8   : > { %v739_v21 = vrot.slane %v738_v20, 1 }
  0xda   : > { %v1262_v22 = vpop.eup %1261  ;;  %v740_v23 = vmax.f32 %v738_v20, %v739_v21 }
  0xdb   : > { %v747_v24 = vrot.slane %v1262_v22, 4 }
  0xdc   : > { %v742_v25 = vsub.f32 %v728_v14, %v740_v23 }
  0xdd   : > { %v748_v26 = vadd.f32 %v1262_v22, %v747_v24 }
  0xde   : > { %v745_v27 = vmul.f32 1.442695, %v742_v25 }
  0xdf   : > { %v749_v28 = vrot.slane %v748_v26, 2 }
  0xe0   : > { %1263 = vpow2.f32 %v745_v27 }
  0xe1   : > { %v750_v29 = vadd.f32 %v749_v28, %v748_v26 }
  0xe3   : > { %v751_v30 = vrot.slane %v750_v29, 1 }
  0xe5   : > { %v752_v32 = vadd.f32 %v751_v30, %v750_v29 }
  0xe6   : > { %v1566_v33 = vpop.eup %1263 }
  0xe7   : > { %1265 = vrcp.f32 %v752_v32  ;;  %v753_v34 = vrot.slane %v1566_v33, 4  ;;  %v770_v47 = vand.u32 2147483648, %v752_v32  ;;  %v768_v3 = vand.u32 2147483647, %v752_v32 }
  0xe8   : > { %vm764_vm2 = vweird.f32 %v752_v32 }
  0xe9   : > { %v754_v35 = vadd.f32 %v1566_v33, %v753_v34  ;;  %v771_v56 = vor.u32 1.1754944e-38, %v770_v47  ;;  %vm769_vm4 = vcmp.eq.f32.partialorder %v768_v3, 8.507059e+37  ;;  %v1151_v34 = vadd.f32 -1.0, %v862_v15 }
  0xea   : > { %v855_v47 = vsub.f32 %v1590_v57, %v1587_v55 }
  0xeb   : > { %v755_v37 = vrot.slane %v754_v35, 2 }
  0xec   : > { %v863_v58 = vmul.f32 %v855_v47, %v855_v47 }
  0xed   : > { %v1266_v38 = vpop.eup %1265  ;;  %v756_v41 = vadd.f32 %v755_v37, %v754_v35 }
  0xee   : > { %v760_v40 = vmul.f32 %v1266_v38, %v752_v32  ;;  %vm765_vm1 = vweird.f32 %v1266_v38 }
  0xef   : > { %v757_v45 = vrot.slane %v756_v41, 1  ;;  %vm766_vm3 = vmor %vm764_vm2, %vm765_vm1 }
  0xf0   : > { %v761_v44 = vsub.f32 1.0, %v760_v40 }
  0xf1   : > { %v1584_v52 = vadd.f32 %v757_v45, %v756_v41  ;;  %v885_v41 = vmul.f32 %v1603_v4, %v1603_v4 }
  0xf2   : > { %v762_v51 = vmul.f32 %v1266_v38, %v761_v44 }
  0xf3   : > { %1267 = vrcp.f32 %v1584_v52  ;;  %v783_v13 = vand.u32 2147483647, %v1584_v52  ;;  %v785_v24 = vand.u32 2147483648, %v1584_v52  ;;  %vm779_vm6 = vweird.f32 %v1584_v52 }
  0xf4   : > { %v763_v53 = vadd.f32 %v1266_v38, %v762_v51  ;;  %v907_v51 = vmul.f32 %v899_v36, %v899_v36 }
  0xf5   : > { %v786_v40 = vor.u32 1.1754944e-38, %v785_v24  ;;  %vm784_vm8 = vcmp.eq.f32.partialorder %v783_v13, 8.507059e+37 }
  0xf6   : > { %v767_v60 = vsel %vm766_vm3, %v1266_v38, %v763_v53  ;;  %v818_v38 = vmul.f32 %v1600_v5, %v1600_v5 }
  0xf7   : > { %v772_v62 = vsel %vm769_vm4, %v771_v56, %v767_v60 }
  0xf8   : > { %v793_v0 = vmul.f32 %v1262_v22, %v772_v62  ;;  %v1144_v43 = vadd.f32 -1.0, %v818_v38  ;;  %v1160_v62 = vadd.f32 -1.0, %v907_v51 }
  0xf9   : > { %v1268_v7 = vpop.eup %1267 }
  0xfa   : > { %795 = vst [vmem:[%s1595_s22] sm:$0x1f] %v793_v0  ;;  %v799_v8 = vmul.f32 1.4142135, %v793_v0  ;;  %v821_v9 = vperm.slane %v793_v0, 0  ;;  %v888_v10 = vperm.slane %v793_v0, 3  ;;  %v775_v12 = vmul.f32 %v1268_v7, %v1584_v52 }
  0xfb   : > { %v844_v14 = vperm.slane %v793_v0, 1  ;;  %v910_v23 = vperm.slane %v793_v0, 4  ;;  %vm780_vm5 = vweird.f32 %v1268_v7  ;;  %v866_v35 = vperm.slane %v793_v0, 2 }
  0xfc   : > { %v811_v16 = vperm.slane %v799_v8, 0  ;;  %v823_v17 = vmul.f32 %v1143_v2, %v821_v9  ;;  %v878_v18 = vperm.slane %v799_v8, 3  ;;  %v890_v19 = vmul.f32 %v1155_v1, %v888_v10  ;;  %vm781_vm7 = vmor %vm779_vm6, %vm780_vm5 }
  0xfd   : > { %v776_v20 = vsub.f32 1.0, %v775_v12  ;;  %v834_v21 = vperm.slane %v799_v8, 1  ;;  %v900_v22 = vperm.slane %v799_v8, 4  ;;  %v856_v27 = vperm.slane %v799_v8, 2 }
  0xfe   : > { %v813_v25 = vmul.f32 %v811_v16, %v809_v48  ;;  %1145 = vst [vmem:[%s1609_s18 + $0x50] sm:$0xff] %v823_v17  ;;  %v880_v26 = vmul.f32 %v878_v18, %v876_v46  ;;  %v846_v30 = vmul.f32 %v1147_v6, %v844_v14  ;;  %v912_v39 = vmul.f32 %v1159_v11, %v910_v23 }
  0xff   : > { %v777_v28 = vmul.f32 %v1268_v7, %v776_v20  ;;  %1157 = vst [vmem:[%s1609_s18 + $0x80] sm:$0xff] %v890_v19  ;;  %v836_v29 = vmul.f32 %v834_v21, %v832_v49  ;;  %v902_v32 = vmul.f32 %v900_v22, %v898_v50  ;;  %v858_v42 = vmul.f32 %v856_v27, %v854_v63 }
 0x100   : > { %815 = vst [vmem:[%s1609_s18] sm:$0xff] %v813_v25  ;;  %v841_v46 = vmul.f32 %v833_v31, %v833_v31  ;;  %v868_v48 = vmul.f32 %v1151_v34, %v866_v35  ;;  %v1156_v50 = vadd.f32 -1.0, %v885_v41  ;;  %v1152_v8 = vadd.f32 -1.0, %v863_v58 }
 0x101   : > { %v778_v37 = vadd.f32 %v1268_v7, %v777_v28  ;;  %882 = vst [vmem:[%s1609_s18 + $0x30] sm:$0xff] %v880_v26 }
 0x102   : > { %838 = vst [vmem:[%s1609_s18 + $0x10] sm:$0xff] %v836_v29  ;;  %v1148_v54 = vadd.f32 -1.0, %v841_v46 }
 0x103   : > { %v782_v44 = vsel %vm781_vm7, %v1268_v7, %v778_v37  ;;  %1149 = vst [vmem:[%s1609_s18 + $0x60] sm:$0xff] %v846_v30 }
 0x104   : > { %v787_v45 = vsel %vm784_vm8, %v786_v40, %v782_v44  ;;  %904 = vst [vmem:[%s1609_s18 + $0x40] sm:$0xff] %v902_v32 }
 0x105   : > { %v794_v49 = vmul.f32 %v1566_v33, %v787_v45  ;;  %1161 = vst [vmem:[%s1609_s18 + $0x90] sm:$0xff] %v912_v39 }
 0x106   : > { %860 = vst [vmem:[%s1609_s18 + $0x20] sm:$0xff] %v858_v42 }
 0x107   : > { %796 = vst [vmem:[%s1595_s22 + $0x8] sm:$0x1f] %v794_v49  ;;  %v800_v3 = vmul.f32 1.4142135, %v794_v49  ;;  %v822_v52 = vperm.slane %v794_v49, 0  ;;  %v889_v53 = vperm.slane %v794_v49, 3 }
 0x108   : > { %v845_v56 = vperm.slane %v794_v49, 1  ;;  %1153 = vst [vmem:[%s1609_s18 + $0x70] sm:$0xff] %v868_v48  ;;  %v911_v63 = vperm.slane %v794_v49, 4  ;;  %v867_v9 = vperm.slane %v794_v49, 2  ;;  %s1319_s22 = scalar_lea.hbm %s1701_s7, 1280 }
 0x109   : > { %v812_v55 = vperm.slane %v800_v3, 0  ;;  %v824_v57 = vmul.f32 %v1144_v43, %v822_v52  ;;  %v879_v59 = vperm.slane %v800_v3, 3  ;;  %v891_v33 = vmul.f32 %v1156_v50, %v889_v53  ;;  %p1321_p11 = scmp.lt.s32.totalorder %s1319_s22, %s1315_s11 }
 0x10a   : > { %v835_v60 = vperm.slane %v800_v3, 1  ;;  %v901_v61 = vperm.slane %v800_v3, 4  ;;  %v857_v2 = vperm.slane %v800_v3, 2  ;;  %v847_v7 = vmul.f32 %v1148_v54, %v845_v56 }
 0x10b   : > { %v814_v0 = vmul.f32 %v812_v55, %v1600_v5  ;;  %1146 = vst [vmem:[%s1609_s18 + $0x58] sm:$0xff] %v824_v57  ;;  %v881_v1 = vmul.f32 %v879_v59, %v1603_v4  ;;  %v913_v5 = vmul.f32 %v1160_v62, %v911_v63  ;;  %v869_v11 = vmul.f32 %v1152_v8, %v867_v9  ;;  %p1322_p13 = por %p1321_p11, %p1320_p10 }
 0x10c   : > { %1158 = vst [vmem:[%s1609_s18 + $0x88] sm:$0xff] %v891_v33  ;;  %v837_v6 = vmul.f32 %v835_v60, %v833_v31  ;;  %v903_v10 = vmul.f32 %v901_v61, %v899_v36  ;;  %v859_v4 = vmul.f32 %v857_v2, %v855_v47 }
 0x10d   : > { %816 = vst [vmem:[%s1609_s18 + $0x8] sm:$0xff] %v814_v0  ;;  %p1323_p0 = pnand %p1322_p13, %p1318_p8 }
 0x10e   : > { %883 = vst [vmem:[%s1609_s18 + $0x38] sm:$0xff] %v881_v1 }
 0x10f   : > { %839 = vst [vmem:[%s1609_s18 + $0x18] sm:$0xff] %v837_v6 }
 0x110   : > { %1150 = vst [vmem:[%s1609_s18 + $0x68] sm:$0xff] %v847_v7 }
 0x111   : > { %905 = vst [vmem:[%s1609_s18 + $0x48] sm:$0xff] %v903_v10 }
 0x112   : > { %1162 = vst [vmem:[%s1609_s18 + $0x98] sm:$0xff] %v913_v5 }
 0x113   : > { %861 = vst [vmem:[%s1609_s18 + $0x28] sm:$0xff] %v859_v4 }
 0x114   : > { %1154 = vst [vmem:[%s1609_s18 + $0x78] sm:$0xff] %v869_v11 }
 0x115   : > { %1326 = shalt.err (!%p1323_p0)
}
 0x116   : > { %s1404_s21 = smov 256   ;;  %s1405_s18 = smov 1024  }
 0x117   : > { %s1406_s27 = smov 16  }
 0x118   : > { %1171 = dma.vmem_to_hbm [thread:$0]  (%p1512_p9), %s948_s16, 2560, %s950_s12, %s926_s17, %s1404_s21, %s1405_s18, %s1406_s27  }
 0x119 PF: > { %p1182_p1 = scmp.ge.s32.totalorder %s1397_s29, 2  ;;  %s976_s23 = sand.u32 1, %s1369_s24  }
 0x11a   : > { %s977_s30 = scalar_lea.sflag [#allocation4], %s976_s23 }
 0x11b   : > { %p1178_p2 = pnand %p1182_p1, %p1518_p12 }
 0x11d   : > { %p1179_p4 = pneg %p1178_p2 }
 0x11f   : > { %1364 = dma.done.wait (%p1179_p4), %s977_s30, 2560  }
 0x120   : > { %1366 = vsyncadd (%p1179_p4), %s977_s30, 4294964736  ;;  %s24_s29 = sadd.s32 1, %s1397_s29   ;;  %s1713_s15 = sld [smem:[#allocation8_spill]] }
 0x121   : > { %p21_p3 = scmp.ge.s32.totalorder %s24_s29, 10   ;;  %s1714_s8 = sld [smem:[#allocation9_spill]] }
 0x122   : > { %s1715_s24 = smov %s1373_s25  ;;  %s1716_s25 = smov %s1377_s3 }
 0x123   : > { %s1717_s3 = smov %s1525_s20  ;;  %s1718_s26 = smov %s1389_s5 }
 0x124   : > { %s1719_s27 = smov %s1393_s28  ;;  %23 = sbr.rel (!%p21_p3) target bundleno = 7 (0x7), region = 115 }
 0x126   : > { %s1720_s5 = smov %s1713_s15 }
 0x127   : > { %s1721_s28 = smov %s1714_s8 }
 0x129   :  { %983 = vsyncpa [#allocation3], 1 }
 0x12a   :  { %985 = vsyncpa [#allocation3 + $0x1], 1 }
 0x12b   :  { %986 = vsyncpa [#allocation4], 1 }
 0x12c   :  { %988 = vsyncpa [#allocation4 + $0x1], 1 }

</bundles_post_ra>
